<compile_context>
chip_gen: v5e
topology: v5e:2x2
jax: 0.10.0
libtpu: 0.0.40
codegen_flags: <defaults>
</compile_context>

<pallas_src>
import jax
import jax.numpy as jnp
from jax.experimental import pallas as pl
from jax.experimental.pallas import tpu as pltpu


def _round_up(x, m):
    return (x + m - 1) // m * m


def _flatten(x):
    if x.ndim == 4:
        assert x.shape[2] == 1 and x.shape[3] == 1, "expected (B, C, 1, 1)"
        return x.reshape(x.shape[0], x.shape[1])
    return x


# --------------------------------------------------------------------------- #
# Kernel
# --------------------------------------------------------------------------- #
def nae_kernel(x1_ref, x2_ref, w1_ref, w2_ref, t1_ref, t2_ref, rs_rt_ref,
               emb_ref, logit_ref):
    cd = w1_ref.dtype  # compute dtype chosen at prepare_params() time

    # Two projectors; BN scale already folded into the weight columns.
    # In-kernel activation cast (free under DMA); MXU accumulates in f32.
    e1 = jnp.dot(x1_ref[...].astype(cd), w1_ref[...],
                 preferred_element_type=jnp.float32) + t1_ref[...]      # (tb, D1)
    e2 = jnp.dot(x2_ref[...].astype(cd), w2_ref[...],
                 preferred_element_type=jnp.float32) + t2_ref[...]      # (tb, D2)

    # Row-wise L2 norm over the concatenated embedding (never materialized).
    sumsq = (jnp.sum(e1 * e1, axis=-1, keepdims=True) +
             jnp.sum(e2 * e2, axis=-1, keepdims=True))                  # (tb, 1)
    # 1/clamp(norm,1e-12) == rsqrt(clamp(norm^2,1e-24)); rsqrt runs on the EUP.
    inv = jax.lax.rsqrt(jnp.maximum(sumsq, 1e-24))

    d1 = w1_ref.shape[1]
    emb_ref[:, :d1] = (e1 * inv).astype(emb_ref.dtype)   # lane-dense stores
    emb_ref[:, d1:] = (e2 * inv).astype(emb_ref.dtype)

    # rescaler = BatchNorm1d(1) folded to a scalar affine (scalars in SMEM).
    norms = jnp.sqrt(sumsq)
    # TODO(synk): the (tb, 1) logit store is narrow (masked vst); a lane-dense
    #             (1, tb) layout needs a column->row relayout and only matters
    #             on v5e's single store slot, so it is kept simple and robust.
    logit_ref[...] = norms * rs_rt_ref[0] + rs_rt_ref[1]


# --------------------------------------------------------------------------- #
# Wrapper
# --------------------------------------------------------------------------- #
def norm_aware_embedding(feat1, feat2, prepared, *, tb=1024, out_dtype=None):
    """NAE forward.  `prepared` comes from prepare_params() (fusion hoisted).

    Returns (embeddings (B, dim) in out_dtype, logits (B,) float32).
    """
    w1, t1, w2, t2, rs_rt = prepared
    x1 = _flatten(feat1)
    x2 = _flatten(feat2)
    assert x1.shape[0] == x2.shape[0]
    B = x1.shape[0]
    C1, D1 = w1.shape
    C2, D2 = w2.shape
    assert x1.shape[1] == C1 and x2.shape[1] == C2
    D = D1 + D2
    if out_dtype is None:
        out_dtype = jnp.float32

    # Batch tile: large (amortizes ~0.35us/step, keeps DMA/MXU tiles full),
    # 16-row aligned (legal for f32 and bf16 packing), capped for small B.
    row_align = 16
    tb_eff = max(row_align,
                 min(_round_up(tb, row_align), _round_up(B, row_align)))
    B_pad = _round_up(B, tb_eff)
    if B_pad != B:
        # Padded rows compute garbage; they are sliced off before returning.
        x1 = jnp.pad(x1, ((0, B_pad - B), (0, 0)))
        x2 = jnp.pad(x2, ((0, B_pad - B), (0, 0)))
    grid = (B_pad // tb_eff,)

    in_specs = [
        pl.BlockSpec((tb_eff, C1), lambda i: (i, 0)),            # feat1 tile
        pl.BlockSpec((tb_eff, C2), lambda i: (i, 0)),            # feat2 tile
        # Constant block index => DMA'd once across the whole grid.
        pl.BlockSpec((C1, D1), lambda i: (0, 0)),                # W1 (BN-folded)
        pl.BlockSpec((C2, D2), lambda i: (0, 0)),                # W2 (BN-folded)
        pl.BlockSpec((1, D1), lambda i: (0, 0)),                 # shift1 (f32)
        pl.BlockSpec((1, D2), lambda i: (0, 0)),                 # shift2 (f32)
        pl.BlockSpec(memory_space=pltpu.MemorySpace.SMEM),       # rescaler [rs, rt]
    ]
    out_specs = [
        pl.BlockSpec((tb_eff, D), lambda i: (i, 0)),             # embeddings
        pl.BlockSpec((tb_eff, 1), lambda i: (i, 0)),             # logits
    ]

    emb, logits = pl.pallas_call(
        nae_kernel,
        out_shape=(jax.ShapeDtypeStruct((B_pad, D), out_dtype),
                   jax.ShapeDtypeStruct((B_pad, 1), jnp.float32)),
        grid_spec=pltpu.PrefetchScalarGridSpec(
            num_scalar_prefetch=0,
            grid=grid,
            in_specs=in_specs,
            out_specs=out_specs,
        ),
        # "parallel" shards the batch axis across TensorCores on multi-TC chips
        # (v7x); pltpu.CORE_PARALLEL is a further v7x-specific tuning option.
        compiler_params=pltpu.CompilerParams(
            dimension_semantics=("parallel",)),
    )(x1, x2, w1, w2, t1, t2, rs_rt)

    return emb[:B], logits[:B, 0]


# --------------------------------------------------------------------------- #
# Parameter handling (raw PyTorch-style params -> folded kernel params, once)
# --------------------------------------------------------------------------- #
def init_params(key, in_channels, indv_dims):
    """Raw PyTorch-style parameters mirroring the module __init__ (eval mode
    buffers included; running stats are randomized to exercise the BN folds)."""
    projs = []
    keys = jax.random.split(key, 4 * len(in_channels))
    for idx, (c, d) in enumerate(zip(in_channels, indv_dims)):
        kw, kg, km, kv = keys[4 * idx: 4 * idx + 4]
        projs.append(dict(
            w=0.01 * jax.random.normal(kw, (d, c), jnp.float32),    # Linear.weight (out,in)
            b=jnp.zeros((d,), jnp.float32),                         # Linear.bias = 0
            gamma=0.01 * jax.random.normal(kg, (d,), jnp.float32),  # BN.weight ~ N(0, .01)
            beta=jnp.zeros((d,), jnp.float32),                      # BN.bias = 0
            mean=0.1 * jax.random.normal(km, (d,), jnp.float32),
            var=jnp.abs(jax.random.normal(kv, (d,), jnp.float32)) + 0.5,
        ))
    rescaler = dict(gamma=jnp.ones((1,), jnp.float32),
                    beta=jnp.zeros((1,), jnp.float32),
                    mean=jnp.array([0.3], jnp.float32),
                    var=jnp.array([1.5], jnp.float32))
    return projs, rescaler


def prepare_params(raw, compute_dtype=jnp.float32, eps=1e-5):
    """One-time fusion (call at init, NOT per forward):
       * BN(eval) scale folded into the Linear weight columns,
       * shift = (bias - running_mean)*scale + beta kept in f32,
       * rescaler BatchNorm1d(1) folded to [rs, rt] scalars (handles nonzero
         running_mean: rt = beta - running_mean*rs),
       * weights cast once to compute_dtype (bf16 halves weight HBM traffic)."""
    projs, rescaler = raw
    out = []
    for p in projs:
        sc = p["gamma"] / jnp.sqrt(p["var"] + eps)                     # (d,)
        w_f = (p["w"].T * sc[None, :]).astype(compute_dtype)           # (c, d)
        t = ((p["b"] - p["mean"]) * sc + p["beta"]).reshape(1, -1)     # (1, d) f32
        out += [w_f, t.astype(jnp.float32)]
    rs = rescaler["gamma"][0] / jnp.sqrt(rescaler["var"][0] + eps)
    rt = rescaler["beta"][0] - rescaler["mean"][0] * rs
    rs_rt = jnp.stack([rs, rt]).astype(jnp.float32)                    # (2,) SMEM
    w1, t1, w2, t2 = out
    return (w1, t1, w2, t2, rs_rt)


def ref_forward(feat1, feat2, raw, eps=1e-5):
    """Pure-JAX reference of the PyTorch eval-mode forward (unfolded)."""
    projs, rescaler = raw
    xs = [feat1.reshape(feat1.shape[0], -1).astype(jnp.float32),
          feat2.reshape(feat2.shape[0], -1).astype(jnp.float32)]
    outs = []
    for x, p in zip(xs, projs):
        y = x @ p["w"].T + p["b"]
        y = (y - p["mean"]) / jnp.sqrt(p["var"] + eps) * p["gamma"] + p["beta"]
        outs.append(y)
    emb = jnp.concatenate(outs, axis=1)
    n = jnp.sqrt(jnp.sum(emb * emb, axis=1, keepdims=True))
    emb_n = emb / jnp.maximum(n, 1e-12)
    logits = ((n - rescaler["mean"]) / jnp.sqrt(rescaler["var"] + eps)
              * rescaler["gamma"] + rescaler["beta"])[:, 0]
    return emb_n, logits


# --------------------------------------------------------------------------- #
# Demo / correctness check
# --------------------------------------------------------------------------- #
if __name__ == "__main__":
    # Small shapes consistent with the module: two featmaps (NCHW, H=W=1),
    # in_channels=[128, 256], dim=256 -> indv_dims=[128, 128].
    B = 16
    in_channels = [128, 256]
    dim = 256
    indv_dims = [dim // 2, dim // 2]

    key = jax.random.PRNGKey(0)
    k_p, k_x1, k_x2 = jax.random.split(key, 3)

    raw = init_params(k_p, in_channels, indv_dims)
    feat_res4 = jax.random.normal(k_x1, (B, in_channels[0], 1, 1), dtype=jnp.float32)
    feat_res5 = jax.random.normal(k_x2, (B, in_channels[1], 1, 1), dtype=jnp.float32)

    emb_ref, logits_ref = ref_forward(feat_res4, feat_res5, raw)

    # --- f32 path: tight-tolerance check against the pure-JAX reference ---
    params_f32 = prepare_params(raw, compute_dtype=jnp.float32)
    emb, logits = norm_aware_embedding(feat_res4, feat_res5, params_f32)
    emb = jax.block_until_ready(emb)
    logits = jax.block_until_ready(logits)
    assert emb.shape == (B, dim) and logits.shape == (B,)
    assert jnp.allclose(emb, emb_ref, atol=1e-5, rtol=1e-5)
    assert jnp.allclose(logits, logits_ref, atol=1e-5, rtol=1e-5)

    # --- bf16 I/O path (producer emits bf16 activations; bf16 emb writeback) ---
    params_bf16 = prepare_params(raw, compute_dtype=jnp.bfloat16)
    emb16, logits16 = norm_aware_embedding(
        feat_res4.astype(jnp.bfloat16), feat_res5.astype(jnp.bfloat16),
        params_bf16, out_dtype=jnp.bfloat16)
    emb16 = jax.block_until_ready(emb16)
    logits16 = jax.block_until_ready(logits16)
    assert emb16.dtype == jnp.bfloat16 and logits16.dtype == jnp.float32
    assert jnp.allclose(emb16.astype(jnp.float32), emb_ref, atol=2e-2, rtol=2e-2)
    assert jnp.allclose(logits16, logits_ref, atol=2e-2, rtol=2e-2)

    # --- ragged batch (exercises the pad-to-tile path; no B % tb restriction) ---
    Bo = 10
    embo, logitso = norm_aware_embedding(feat_res4[:Bo], feat_res5[:Bo], params_f32)
    embo = jax.block_until_ready(embo)
    assert embo.shape == (Bo, dim) and logitso.shape == (Bo,)
    assert jnp.allclose(embo, emb_ref[:Bo], atol=1e-5, rtol=1e-5)
    assert jnp.allclose(logitso, logits_ref[:Bo], atol=1e-5, rtol=1e-5)

    print("KERNEL_OK")
</pallas_src>

<mosaic_0001>
module attributes {stable_mosaic.version = 11 : i64} {
  func.func @nae_kernel(%arg0: i32, %arg1: memref<16x128xf32, #tpu.memory_space<vmem>>, %arg2: memref<16x256xf32, #tpu.memory_space<vmem>>, %arg3: memref<128x128xf32, #tpu.memory_space<vmem>>, %arg4: memref<256x128xf32, #tpu.memory_space<vmem>>, %arg5: memref<1x128xf32, #tpu.memory_space<vmem>>, %arg6: memref<1x128xf32, #tpu.memory_space<vmem>>, %arg7: memref<2xf32, #tpu.memory_space<smem>>, %arg8: memref<16x256xf32, #tpu.memory_space<vmem>>, %arg9: memref<16x1xf32, #tpu.memory_space<vmem>>) attributes {dimension_semantics = [#tpu.dimension_semantics<parallel>], iteration_bounds = array<i64: 1>, scalar_prefetch = 0 : i64, scratch_operands = 0 : i64, tpu.core_type = #tpu.core_type<tc>, window_params = [{transform_indices = @transform_0, window_bounds = array<i64: 16, 128>}, {transform_indices = @transform_1, window_bounds = array<i64: 16, 256>}, {pipeline_mode = #tpu.pipeline_mode<synchronous>, transform_indices = @transform_2, window_bounds = array<i64: 128, 128>}, {pipeline_mode = #tpu.pipeline_mode<synchronous>, transform_indices = @transform_3, window_bounds = array<i64: 256, 128>}, {pipeline_mode = #tpu.pipeline_mode<synchronous>, transform_indices = @transform_4, window_bounds = array<i64: 1, 128>}, {pipeline_mode = #tpu.pipeline_mode<synchronous>, transform_indices = @transform_5, window_bounds = array<i64: 1, 128>}, {transform_indices = @transform_6, window_bounds = array<i64: 2>}, {transform_indices = @transform_7, window_bounds = array<i64: 16, 256>}, {transform_indices = @transform_8, window_bounds = array<i64: 16, 1>}]} {
    %c0 = arith.constant 0 : index
    %c0_0 = arith.constant 0 : index
    %0 = vector.load %arg1[%c0, %c0_0] : memref<16x128xf32, #tpu.memory_space<vmem>>, vector<16x128xf32>
    %c0_1 = arith.constant 0 : index
    %c0_2 = arith.constant 0 : index
    %1 = vector.load %arg3[%c0_1, %c0_2] : memref<128x128xf32, #tpu.memory_space<vmem>>, vector<128x128xf32>
    %cst = arith.constant dense<0.000000e+00> : vector<16x128xf32>
    %2 = tpu.matmul %0, %1, %cst {dimension_numbers = #tpu.dot_dimension_numbers<[1], [0], [0], [1], [0, 0, 1, 1], [], []>} : vector<16x128xf32>, vector<128x128xf32>, vector<16x128xf32> -> vector<16x128xf32>
    %c0_3 = arith.constant 0 : index
    %c0_4 = arith.constant 0 : index
    %3 = vector.load %arg5[%c0_3, %c0_4] : memref<1x128xf32, #tpu.memory_space<vmem>>, vector<1x128xf32>
    %4 = vector.broadcast %3 : vector<1x128xf32> to vector<16x128xf32>
    %5 = arith.addf %2, %4 : vector<16x128xf32>
    %c0_5 = arith.constant 0 : index
    %c0_6 = arith.constant 0 : index
    %6 = vector.load %arg2[%c0_5, %c0_6] : memref<16x256xf32, #tpu.memory_space<vmem>>, vector<16x256xf32>
    %c0_7 = arith.constant 0 : index
    %c0_8 = arith.constant 0 : index
    %7 = vector.load %arg4[%c0_7, %c0_8] : memref<256x128xf32, #tpu.memory_space<vmem>>, vector<256x128xf32>
    %cst_9 = arith.constant dense<0.000000e+00> : vector<16x128xf32>
    %8 = tpu.matmul %6, %7, %cst_9 {dimension_numbers = #tpu.dot_dimension_numbers<[1], [0], [0], [1], [0, 0, 1, 1], [], []>} : vector<16x256xf32>, vector<256x128xf32>, vector<16x128xf32> -> vector<16x128xf32>
    %c0_10 = arith.constant 0 : index
    %c0_11 = arith.constant 0 : index
    %9 = vector.load %arg6[%c0_10, %c0_11] : memref<1x128xf32, #tpu.memory_space<vmem>>, vector<1x128xf32>
    %10 = vector.broadcast %9 : vector<1x128xf32> to vector<16x128xf32>
    %11 = arith.addf %8, %10 : vector<16x128xf32>
    %12 = arith.mulf %5, %5 : vector<16x128xf32>
    %cst_12 = arith.constant dense<0.000000e+00> : vector<16xf32>
    %13 = vector.multi_reduction <add>, %12, %cst_12 [1] : vector<16x128xf32> to vector<16xf32>
    %14 = vector.shape_cast %13 : vector<16xf32> to vector<16x1xf32>
    %15 = arith.mulf %11, %11 : vector<16x128xf32>
    %cst_13 = arith.constant dense<0.000000e+00> : vector<16xf32>
    %16 = vector.multi_reduction <add>, %15, %cst_13 [1] : vector<16x128xf32> to vector<16xf32>
    %17 = vector.shape_cast %16 : vector<16xf32> to vector<16x1xf32>
    %18 = arith.addf %14, %17 : vector<16x1xf32>
    %cst_14 = arith.constant 1.000000e-24 : f32
    %19 = vector.broadcast %cst_14 : f32 to vector<16x1xf32>
    %20 = arith.maximumf %18, %19 : vector<16x1xf32>
    %21 = math.rsqrt %20 : vector<16x1xf32>
    %22 = vector.broadcast %21 : vector<16x1xf32> to vector<16x128xf32>
    %23 = arith.mulf %5, %22 : vector<16x128xf32>
    %c0_15 = arith.constant 0 : index
    %c0_16 = arith.constant 0 : index
    %24 = vector.load %arg8[%c0_15, %c0_16] : memref<16x256xf32, #tpu.memory_space<vmem>>, vector<16x128xf32>
    tpu.vector_store %arg8[%c0_15, %c0_16], %23 {strides = array<i32>} : memref<16x256xf32, #tpu.memory_space<vmem>>, vector<16x128xf32>,
    %25 = vector.broadcast %21 : vector<16x1xf32> to vector<16x128xf32>
    %26 = arith.mulf %11, %25 : vector<16x128xf32>
    %c0_17 = arith.constant 0 : index
    %c128 = arith.constant 128 : index
    %27 = vector.load %arg8[%c0_17, %c128] : memref<16x256xf32, #tpu.memory_space<vmem>>, vector<16x128xf32>
    tpu.vector_store %arg8[%c0_17, %c128], %26 {strides = array<i32>} : memref<16x256xf32, #tpu.memory_space<vmem>>, vector<16x128xf32>,
    %28 = math.sqrt %18 : vector<16x1xf32>
    %c0_18 = arith.constant 0 : index
    %29 = memref.load %arg7[%c0_18] : memref<2xf32, #tpu.memory_space<smem>>
    %30 = vector.broadcast %29 : f32 to vector<16x1xf32>
    %31 = arith.mulf %28, %30 : vector<16x1xf32>
    %c1 = arith.constant 1 : index
    %32 = memref.load %arg7[%c1] : memref<2xf32, #tpu.memory_space<smem>>
    %33 = vector.broadcast %32 : f32 to vector<16x1xf32>
    %34 = arith.addf %31, %33 : vector<16x1xf32>
    %c0_19 = arith.constant 0 : index
    %c0_20 = arith.constant 0 : index
    %35 = vector.load %arg9[%c0_19, %c0_20] : memref<16x1xf32, #tpu.memory_space<vmem>>, vector<16x1xf32>
    tpu.vector_store %arg9[%c0_19, %c0_20], %34 {strides = array<i32>} : memref<16x1xf32, #tpu.memory_space<vmem>>, vector<16x1xf32>,
    return
  }
  func.func @transform_0(%arg0: i32) -> (i32, i32) {
    %c0_i32 = arith.constant 0 : i32
    %c0_i32_0 = arith.constant 0 : i32
    return %arg0, %c0_i32 : i32, i32
  }
  func.func @transform_1(%arg0: i32) -> (i32, i32) {
    %c0_i32 = arith.constant 0 : i32
    %c0_i32_0 = arith.constant 0 : i32
    return %arg0, %c0_i32 : i32, i32
  }
  func.func @transform_2(%arg0: i32) -> (i32, i32) {
    %c0_i32 = arith.constant 0 : i32
    %c0_i32_0 = arith.constant 0 : i32
    %c0_i32_1 = arith.constant 0 : i32
    return %c0_i32, %c0_i32_0 : i32, i32
  }
  func.func @transform_3(%arg0: i32) -> (i32, i32) {
    %c0_i32 = arith.constant 0 : i32
    %c0_i32_0 = arith.constant 0 : i32
    %c0_i32_1 = arith.constant 0 : i32
    return %c0_i32, %c0_i32_0 : i32, i32
  }
  func.func @transform_4(%arg0: i32) -> (i32, i32) {
    %c0_i32 = arith.constant 0 : i32
    %c0_i32_0 = arith.constant 0 : i32
    %c0_i32_1 = arith.constant 0 : i32
    return %c0_i32, %c0_i32_0 : i32, i32
  }
  func.func @transform_5(%arg0: i32) -> (i32, i32) {
    %c0_i32 = arith.constant 0 : i32
    %c0_i32_0 = arith.constant 0 : i32
    %c0_i32_1 = arith.constant 0 : i32
    return %c0_i32, %c0_i32_0 : i32, i32
  }
  func.func @transform_6(%arg0: i32) -> i32 {
    %c0_i32 = arith.constant 0 : i32
    %c0_i32_0 = arith.constant 0 : i32
    return %c0_i32 : i32
  }
  func.func @transform_7(%arg0: i32) -> (i32, i32) {
    %c0_i32 = arith.constant 0 : i32
    %c0_i32_0 = arith.constant 0 : i32
    return %arg0, %c0_i32 : i32, i32
  }
  func.func @transform_8(%arg0: i32) -> (i32, i32) {
    %c0_i32 = arith.constant 0 : i32
    %c0_i32_0 = arith.constant 0 : i32
    return %arg0, %c0_i32 : i32, i32
  }
}

</mosaic_0001>

<bundles_post_ra>
// kernel: tpu_custom_call.1
= control target key start
LH: loop header
LB: loop body
LE: loop exit
PB: predicated region body
PF: predicated region fallthrough
CT: control target
= control target key end

     0   :  { %14 = vsyncpa [#allocation3], 0  ;;  %s634_s0 = inlined_call_operand.hbm [shape: f32[16,128], index: 0, kind: input, shape index: {}]   ;;  %s635_s1 = inlined_call_operand.hbm [shape: f32[16,256], index: 1, kind: input, shape index: {}]   ;;  %s636_s2 = inlined_call_operand.hbm [shape: f32[128,128], index: 2, kind: input, shape index: {}]   ;;  %s637_s3 = inlined_call_operand.hbm [shape: f32[256,128], index: 3, kind: input, shape index: {}]   ;;  %s638_s4 = inlined_call_operand.vmem [shape: f32[1,128], index: 4, kind: input, shape index: {}]   ;;  %s639_s5 = inlined_call_operand.vmem [shape: f32[1,128], index: 5, kind: input, shape index: {}]   ;;  %s640_s6 = inlined_call_operand.vmem [shape: f32[2], index: 6, kind: input, shape index: {}]   ;;  %s641_s7 = inlined_call_operand.hbm [shape: f32[16,256], index: 7, kind: output, shape index: {0}]   ;;  %s642_s8 = inlined_call_operand.vmem [shape: f32[16,1], index: 8, kind: output, shape index: {1}]  }
   0x1   :  { %15 = vsyncpa [#allocation7], 0 }
   0x2   :  { %16 = vsyncpa [#allocation10], 0 }
   0x3   :  { %17 = vsyncpa [#allocation5], 0  ;;  %s36_s29 = sshll.u32 %s635_s1, 4  ;;  %s37_s29 = int_to_ptr.hbm [resolvable:$true] %s36_s29 }
   0x4   :  { %18 = vsyncpa [#allocation4], 0  ;;  %s520_s30 = smov [#allocation6]   ;;  %s23_s12 = sshll.u32 %s634_s0, 4  ;;  %s24_s12 = int_to_ptr.hbm [resolvable:$true] %s23_s12 }
   0x5   :  { %s38_s9 = sshll.u32 %s520_s30, 4  ;;  %s521_s13 = smov 256   ;;  %s39_s9 = int_to_ptr.vmem [resolvable:$true] %s38_s9 }
   0x6   :  { %s522_s14 = smov 16   ;;  %s523_s15 = smov [#allocation2]  }
   0x7   :  { %44 = dma.hbm_to_vmem [thread:$0]  %s37_s29, 512, %s39_s9, [#allocation7], %s521_s13, %s521_s13, %s522_s14  }
   0x8   :  { %s25_s16 = sshll.u32 %s523_s15, 4  ;;  %s524_s1 = smov 128   ;;  %s26_s16 = int_to_ptr.vmem [resolvable:$true] %s25_s16 }
   0x9   :  { %s525_s17 = smov 8   ;;  %s49_s20 = sshll.u32 %s636_s2, 4  ;;  %s50_s20 = int_to_ptr.hbm [resolvable:$true] %s49_s20 }
   0xa   :  { %31 = dma.hbm_to_vmem [thread:$0]  %s24_s12, 256, %s26_s16, [#allocation3], %s524_s1, %s524_s1, %s525_s17  }
   0xb   :  { %s526_s21 = smov [#allocation8]   ;;  %s62_s24 = sshll.u32 %s637_s3, 4  ;;  %s63_s24 = int_to_ptr.hbm [resolvable:$true] %s62_s24 }
   0xc   :  { %s51_s0 = sshll.u32 %s526_s21, 4  ;;  %s527_s25 = smov [#allocation9]   ;;  %s52_s0 = int_to_ptr.vmem [resolvable:$true] %s51_s0 }
   0xd   :  { %57 = dma.hbm_to_vmem [thread:$0]  %s50_s20, 2048, %s52_s0, [#allocation7], %s524_s1, %s524_s1, %s525_s17  }
   0xe   :  { %s64_s26 = sshll.u32 %s527_s25, 4  ;;  %s80_s29 = sshll.u32 %s640_s6, 4  ;;  %s65_s26 = int_to_ptr.vmem [resolvable:$true] %s64_s26  ;;  %s81_s29 = int_to_ptr.vmem [resolvable:$true] %s80_s29 }
   0xf   :  { %70 = dma.hbm_to_vmem [thread:$0]  %s63_s24, 4096, %s65_s26, [#allocation10], %s524_s1, %s524_s1, %s525_s17  }
  0x10   :  { %s528_s2 = smov [#allocation11]  }
  0x11   :  { %83 = dma.vmem_to_smem %s81_s29, 16, %s528_s2, [#allocation5]  }
  0x12   :  { %510 = dma.done.wait [#allocation3], 256  }
  0x13   :  { %511 = vsyncadd [#allocation3], 4294967040 }
  0x14   :  { %512 = dma.done.wait [#allocation7], 2560  }
  0x15   :  { %513 = vsyncadd [#allocation7], 4294964736 }
  0x16   :  { %514 = dma.done.wait [#allocation10], 4096  }
  0x17   :  { %515 = vsyncadd [#allocation10], 4294963200 }
  0x18   :  { %516 = dma.done.wait [#allocation5], 16  }
  0x19   :  { %517 = vsyncadd [#allocation5], 4294967280 }
  0x1a   :  { %104 = sfence }
  0x1b   :  { %v185_v0 = vld [vmem:[#allocation9 + $0xf8] sm:$0xff]  ;;  %v184_v1 = vld [vmem:[#allocation9 + $0xf0] sm:$0xff]  ;;  %v183_v5 = vld [vmem:[#allocation9 + $0xe8] sm:$0xff]  ;;  %vm312_vm5 = vcmask 7168   ;;  %s529_s12 = smov [#allocation12]   ;;  %s321_s17 = sshll.u32 %s641_s7, 4  ;;  %s322_s17 = int_to_ptr.hbm [resolvable:$true] %s321_s17 }
  0x1c   :  { %v169_v2 = vld [vmem:[#allocation9 + $0x78] sm:$0xff]  ;;  %213 = vmatpush.msra.mxu2 %v185_v0  ;;  %v168_v4 = vld [vmem:[#allocation9 + $0x70] sm:$0xff]  ;;  %v167_v7 = vld [vmem:[#allocation9 + $0x68] sm:$0xff]  ;;  %s319_s15 = sshll.u32 %s529_s12, 4  ;;  %s320_s15 = int_to_ptr.vmem [resolvable:$true] %s319_s15 }
  0x1d   :  { %190 = vmatpush.msra.mxu1 %v169_v2  ;;  %v122_v3 = vld [vmem:[#allocation8 + $0x78] sm:$0xff]  ;;  %v121_v6 = vld [vmem:[#allocation8 + $0x70] sm:$0xff]  ;;  %v120_v8 = vld [vmem:[#allocation8 + $0x68] sm:$0xff] }
  0x1e   :  { %127 = vmatpush.msra.mxu0 %v122_v3  ;;  %342 = vmatpush.msra.mxu3 %v122_v3  ;;  %v182_v9 = vld [vmem:[#allocation9 + $0xe0] sm:$0xff]  ;;  %v181_v12 = vld [vmem:[#allocation9 + $0xd8] sm:$0xff]  ;;  %v180_v15 = vld [vmem:[#allocation9 + $0xd0] sm:$0xff] }
  0x1f   :  { %214 = vmatpush.msra.mxu2 %v184_v1  ;;  %191 = vmatpush.msra.mxu1 %v168_v4  ;;  %v166_v10 = vld [vmem:[#allocation9 + $0x60] sm:$0xff]  ;;  %v165_v13 = vld [vmem:[#allocation9 + $0x58] sm:$0xff]  ;;  %v164_v16 = vld [vmem:[#allocation9 + $0x50] sm:$0xff] }
  0x20   :  { %128 = vmatpush.msra.mxu0 %v121_v6  ;;  %343 = vmatpush.msra.mxu3 %v121_v6  ;;  %v119_v11 = vld [vmem:[#allocation8 + $0x60] sm:$0xff]  ;;  %v118_v14 = vld [vmem:[#allocation8 + $0x58] sm:$0xff]  ;;  %v117_v17 = vld [vmem:[#allocation8 + $0x50] sm:$0xff] }
  0x21   :  { %215 = vmatpush.msra.mxu2 %v183_v5  ;;  %192 = vmatpush.msra.mxu1 %v167_v7  ;;  %v179_v18 = vld [vmem:[#allocation9 + $0xc8] sm:$0xff]  ;;  %v178_v21 = vld [vmem:[#allocation9 + $0xc0] sm:$0xff]  ;;  %v177_v24 = vld [vmem:[#allocation9 + $0xb8] sm:$0xff] }
  0x22   :  { %129 = vmatpush.msra.mxu0 %v120_v8  ;;  %344 = vmatpush.msra.mxu3 %v120_v8  ;;  %v163_v19 = vld [vmem:[#allocation9 + $0x48] sm:$0xff]  ;;  %v162_v22 = vld [vmem:[#allocation9 + $0x40] sm:$0xff]  ;;  %v161_v25 = vld [vmem:[#allocation9 + $0x38] sm:$0xff] }
  0x23   :  { %216 = vmatpush.msra.mxu2 %v182_v9  ;;  %193 = vmatpush.msra.mxu1 %v166_v10  ;;  %v116_v20 = vld [vmem:[#allocation8 + $0x48] sm:$0xff]  ;;  %v115_v23 = vld [vmem:[#allocation8 + $0x40] sm:$0xff]  ;;  %v114_v26 = vld [vmem:[#allocation8 + $0x38] sm:$0xff] }
  0x24   :  { %130 = vmatpush.msra.mxu0 %v119_v11  ;;  %345 = vmatpush.msra.mxu3 %v119_v11  ;;  %v176_v27 = vld [vmem:[#allocation9 + $0xb0] sm:$0xff]  ;;  %v175_v29 = vld [vmem:[#allocation9 + $0xa8] sm:$0xff]  ;;  %v174_v33 = vld [vmem:[#allocation9 + $0xa0] sm:$0xff] }
  0x25   :  { %217 = vmatpush.msra.mxu2 %v181_v12  ;;  %194 = vmatpush.msra.mxu1 %v165_v13  ;;  %v160_v28 = vld [vmem:[#allocation9 + $0x30] sm:$0xff]  ;;  %v159_v31 = vld [vmem:[#allocation9 + $0x28] sm:$0xff]  ;;  %v158_v34 = vld [vmem:[#allocation9 + $0x20] sm:$0xff] }
  0x26   :  { %131 = vmatpush.msra.mxu0 %v118_v14  ;;  %346 = vmatpush.msra.mxu3 %v118_v14  ;;  %v113_v30 = vld [vmem:[#allocation8 + $0x30] sm:$0xff]  ;;  %v112_v32 = vld [vmem:[#allocation8 + $0x28] sm:$0xff]  ;;  %v111_v35 = vld [vmem:[#allocation8 + $0x20] sm:$0xff] }
  0x27   :  { %218 = vmatpush.msra.mxu2 %v180_v15  ;;  %195 = vmatpush.msra.mxu1 %v164_v16  ;;  %v173_v36 = vld [vmem:[#allocation9 + $0x98] sm:$0xff]  ;;  %v172_v39 = vld [vmem:[#allocation9 + $0x90] sm:$0xff]  ;;  %v171_v42 = vld [vmem:[#allocation9 + $0x88] sm:$0xff] }
  0x28   :  { %132 = vmatpush.msra.mxu0 %v117_v17  ;;  %347 = vmatpush.msra.mxu3 %v117_v17  ;;  %v157_v37 = vld [vmem:[#allocation9 + $0x18] sm:$0xff]  ;;  %v156_v40 = vld [vmem:[#allocation9 + $0x10] sm:$0xff]  ;;  %v155_v43 = vld [vmem:[#allocation9 + $0x8] sm:$0xff] }
  0x29   :  { %219 = vmatpush.msra.mxu2 %v179_v18  ;;  %196 = vmatpush.msra.mxu1 %v163_v19  ;;  %v110_v38 = vld [vmem:[#allocation8 + $0x18] sm:$0xff]  ;;  %v109_v41 = vld [vmem:[#allocation8 + $0x10] sm:$0xff]  ;;  %v108_v44 = vld [vmem:[#allocation8 + $0x8] sm:$0xff] }
  0x2a   :  { %133 = vmatpush.msra.mxu0 %v116_v20  ;;  %348 = vmatpush.msra.mxu3 %v116_v20  ;;  %v170_v45 = vld [vmem:[#allocation9 + $0x80] sm:$0xff]  ;;  %v151_v47 = vld [vmem:[#allocation6 + $0x8] sm:$0xff]  ;;  %v105_v50 = vld [vmem:[#allocation2] sm:$0xff] }
  0x2b   :  { %220 = vmatpush.msra.mxu2 %v178_v21  ;;  %197 = vmatpush.msra.mxu1 %v162_v22  ;;  %v154_v46 = vld [vmem:[#allocation9] sm:$0xff]  ;;  %v106_v51 = vld [vmem:[#allocation2 + $0x8] sm:$0xff]  ;;  %v152_v53 = vld [vmem:[#allocation6 + $0x10] sm:$0xff] }
  0x2c   :  { %134 = vmatpush.msra.mxu0 %v115_v23  ;;  %349 = vmatpush.msra.mxu3 %v115_v23  ;;  %v150_v48 = vld [vmem:[#allocation6] sm:$0xff]  ;;  %v153_v52 = vld [vmem:[#allocation6 + $0x18] sm:$0xff]  ;;  %v368_v54 = vld [vmem:[%s639_s5] ss:$0 sm:$0xff]  ;;  %s613_s5 = sld [smem:[#allocation11 + $0x1]] }
  0x2d   :  { %221 = vmatpush.msra.mxu2 %v177_v24  ;;  %198 = vmatpush.msra.mxu1 %v161_v25  ;;  %v107_v49 = vld [vmem:[#allocation8] sm:$0xff]  ;;  %v369_v55 = vld [vmem:[%s638_s4] ss:$0 sm:$0xff]  ;;  %s611_s4 = sld [smem:[#allocation11]] }
  0x2e   :  { %135 = vmatpush.msra.mxu0 %v114_v26  ;;  %350 = vmatpush.msra.mxu3 %v114_v26 }
  0x2f   :  { %222 = vmatpush.msra.mxu2 %v176_v27  ;;  %199 = vmatpush.msra.mxu1 %v160_v28 }
  0x30   :  { %136 = vmatpush.msra.mxu0 %v113_v30  ;;  %351 = vmatpush.msra.mxu3 %v113_v30 }
  0x31   :  { %223 = vmatpush.msra.mxu2 %v175_v29  ;;  %200 = vmatpush.msra.mxu1 %v159_v31 }
  0x32   :  { %137 = vmatpush.msra.mxu0 %v112_v32  ;;  %352 = vmatpush.msra.mxu3 %v112_v32 }
  0x33   :  { %224 = vmatpush.msra.mxu2 %v174_v33  ;;  %201 = vmatpush.msra.mxu1 %v158_v34  ;;  %v305_v30 = vstv %s611_s4 }
  0x34   :  { %138 = vmatpush.msra.mxu0 %v111_v35  ;;  %353 = vmatpush.msra.mxu3 %v111_v35 }
  0x35   :  { %225 = vmatpush.msra.mxu2 %v173_v36  ;;  %202 = vmatpush.msra.mxu1 %v157_v37 }
  0x36   :  { %139 = vmatpush.msra.mxu0 %v110_v38  ;;  %354 = vmatpush.msra.mxu3 %v110_v38  ;;  %v309_v38 = vstv %s613_s5 }
  0x37   :  { %226 = vmatpush.msra.mxu2 %v172_v39  ;;  %203 = vmatpush.msra.mxu1 %v156_v40 }
  0x38   :  { %140 = vmatpush.msra.mxu0 %v109_v41  ;;  %355 = vmatpush.msra.mxu3 %v109_v41 }
  0x39   :  { %227 = vmatpush.msra.mxu2 %v171_v42  ;;  %204 = vmatpush.msra.mxu1 %v155_v43 }
  0x3a   :  { %141 = vmatpush.msra.mxu0 %v108_v44  ;;  %356 = vmatpush.msra.mxu3 %v108_v44 }
  0x3b   :  { %228 = vmatpush.msra.mxu2 %v170_v45  ;;  %205 = vmatpush.msra.mxu1 %v154_v46 }
  0x3c   :  { %229 = vmatmul.f32.vlgmr.msra.gmra.mxu2 %v151_v47  ;;  %206 = vmatmul.f32.vlgmr.msra.gmra.mxu1 %v150_v48 }
  0x3d   :  { %142 = vmatpush.msra.mxu0 %v107_v49  ;;  %357 = vmatpush.msra.mxu3 %v107_v49 }
  0x3e   :  { %143 = vmatmul.f32.vlgmr.msra.gmra.mxu0 %v105_v50  ;;  %146 = vmatmul.f32.vlgmr.msra.gmra.mxu3 %v106_v51 }
  0x44   :  { %232 = vmatmul.f32.gmra.mxu2 %v153_v52  ;;  %209 = vmatmul.f32.gmra.mxu1 %v152_v53 }
  0xb9   :  { %v207_v56 = vpop.f32.mrf.mxu1 }
  0xba   :  { %v208_v58 = vadd.f32 %v368_v54, %v207_v56 }
  0xbb   :  { %v144_v57 = vpop.f32.mrf.mxu0 }
  0xbc   :  { %v599_v59 = vadd.f32 %v369_v55, %v144_v57 }
  0xbe   :  { %v236_v60 = vmul.f32 %v599_v59, %v599_v59 }
  0xbf   :  { %v230_v61 = vpop.f32.mrf.mxu2 }
  0xc0   :  { %v231_v62 = vadd.f32 %v230_v61, %v208_v58  ;;  %238 = vadd.xlane.f32.xlu0 %v236_v60 }
  0xc1   :  { %v210_v63 = vpop.f32.mrf.mxu1  ;;  %v147_v0 = vpop.f32.mrf.mxu3 }
  0xc2   :  { %v242_v1 = vmul.f32 %v231_v62, %v231_v62  ;;  %v603_v2 = vadd.f32 %v369_v55, %v147_v0  ;;  %v211_v3 = vadd.f32 %v368_v54, %v210_v63 }
  0xc4   :  { %244 = vadd.xlane.f32.xlu1 %v242_v1  ;;  %v237_v4 = vmul.f32 %v603_v2, %v603_v2 }
  0xc7   :  { %v233_v5 = vpop.f32.mrf.mxu2 }
  0xc8   :  { %v607_v6 = vadd.f32 %v233_v5, %v211_v3  ;;  %240 = vadd.xlane.f32.xlu0 %v237_v4 }
  0xca   :  { %v243_v7 = vmul.f32 %v607_v6, %v607_v6 }
  0xcc   :  { %246 = vadd.xlane.f32.xlu1 %v243_v7 }
 0x133   :  { %v239_v8 = vpop.xlane.xlu0 %238 }
 0x137   :  { %v245_v9 = vpop.xlane.xlu1 %244 }
 0x138   :  { %v248_v10 = vadd.f32 %v245_v9, %v239_v8 }
 0x13a   :  { %370 = vrsqrt.f32 %v248_v10  ;;  %v250_v11 = vmax.f32 %v248_v10, 1e-24  ;;  %vm287_vm1 = vcmp.eq.f32.partialorder %v248_v10, inf  ;;  %v290_v33 = vand.u32 2147483648, %v248_v10 }
 0x13b   :  { %v241_v12 = vpop.xlane.xlu0 %240  ;;  %vm289_vm3 = vcmp.eq.f32.partialorder %v248_v10, 0.0 }
 0x13c   :  { %372 = vrsqrt.f32 %v250_v11  ;;  %vm258_vm2 = vweird.f32 %v250_v11 }
 0x13f   :  { %v247_v13 = vpop.xlane.xlu1 %246 }
 0x140   :  { %v371_v14 = vpop.eup %370  ;;  %v249_v15 = vadd.f32 %v247_v13, %v241_v12 }
 0x141   :  { %v281_v16 = vmul.f32 %v371_v14, %v248_v10 }
 0x142   :  { %374 = vrsqrt.f32 %v249_v15  ;;  %v373_v17 = vpop.eup %372  ;;  %v251_v19 = vmax.f32 %v249_v15, 1e-24  ;;  %vm299_vm7 = vcmp.eq.f32.partialorder %v249_v15, inf  ;;  %v302_v51 = vand.u32 2147483648, %v249_v15 }
 0x143   :  { %v282_v18 = vmul.f32 %v371_v14, %v281_v16  ;;  %v253_v20 = vmul.f32 %v373_v17, %v250_v11  ;;  %vm259_vm0 = vweird.f32 %v373_v17  ;;  %vm301_vm9 = vcmp.eq.f32.partialorder %v249_v15, 0.0 }
 0x144   :  { %376 = vrsqrt.f32 %v251_v19  ;;  %vm260_vm4 = vmor %vm258_vm2, %vm259_vm0  ;;  %vm268_vm8 = vweird.f32 %v251_v19 }
 0x145   :  { %v283_v21 = vmul.f32 0.5, %v282_v18  ;;  %v254_v22 = vmul.f32 %v373_v17, %v253_v20 }
 0x147   :  { %v284_v23 = vsub.f32 1.5, %v283_v21  ;;  %v255_v25 = vmul.f32 0.5, %v254_v22 }
 0x148   :  { %v375_v24 = vpop.eup %374 }
 0x149   :  { %v285_v26 = vmul.f32 %v371_v14, %v284_v23  ;;  %v293_v27 = vmul.f32 %v375_v24, %v249_v15  ;;  %v256_v28 = vsub.f32 1.5, %v255_v25 }
 0x14a   :  { %v377_v29 = vpop.eup %376 }
 0x14b   :  { %v286_v31 = vmul.f32 %v285_v26, %v248_v10  ;;  %v294_v32 = vmul.f32 %v375_v24, %v293_v27  ;;  %v257_v34 = vmul.f32 %v373_v17, %v256_v28  ;;  %v263_v35 = vmul.f32 %v377_v29, %v251_v19 }
 0x14c   :  { %vm269_vm6 = vweird.f32 %v377_v29 }
 0x14d   :  { %v288_v36 = vsel %vm287_vm1, %v248_v10, %v286_v31  ;;  %v295_v37 = vmul.f32 0.5, %v294_v32  ;;  %v261_v40 = vsel %vm260_vm4, %v373_v17, %v257_v34  ;;  %v264_v41 = vmul.f32 %v377_v29, %v263_v35  ;;  %vm270_vm10 = vmor %vm268_vm8, %vm269_vm6 }
 0x14e   :  { %v291_v39 = vsel %vm289_vm3, %v290_v33, %v288_v36  ;;  %v272_v44 = vmul.f32 %v261_v40, %v599_v59  ;;  %v276_v45 = vmul.f32 %v261_v40, %v231_v62 }
 0x14f   :  { %v306_v42 = vmul.f32 %v305_v30, %v291_v39  ;;  %v296_v43 = vsub.f32 1.5, %v295_v37  ;;  %v265_v46 = vmul.f32 0.5, %v264_v41 }
 0x150   :  { %274 = vst [vmem:[#allocation12] sm:$0xff] %v272_v44 }
 0x151   :  { %v310_v47 = vadd.f32 %v309_v38, %v306_v42  ;;  %v297_v48 = vmul.f32 %v375_v24, %v296_v43  ;;  %v266_v49 = vsub.f32 1.5, %v265_v46  ;;  %278 = vst [vmem:[#allocation12 + $0x8] sm:$0xff] %v276_v45 }
 0x153   :  { %313 = vst.msk [vmem:[%s642_s8] sm:$0xff] %vm312_vm5, %v310_v47  ;;  %v298_v50 = vmul.f32 %v297_v48, %v249_v15  ;;  %v267_v52 = vmul.f32 %v377_v29, %v266_v49 }
 0x155   :  { %v300_v53 = vsel %vm299_vm7, %v249_v15, %v298_v50  ;;  %v271_v55 = vsel %vm270_vm10, %v377_v29, %v267_v52 }
 0x156   :  { %v303_v54 = vsel %vm301_vm9, %v302_v51, %v300_v53  ;;  %v273_v57 = vmul.f32 %v271_v55, %v603_v2  ;;  %v277_v58 = vmul.f32 %v271_v55, %v607_v6 }
 0x157   :  { %v307_v56 = vmul.f32 %v305_v30, %v303_v54 }
 0x158   :  { %275 = vst [vmem:[#allocation12 + $0x10] sm:$0xff] %v273_v57 }
 0x159   :  { %v311_v59 = vadd.f32 %v309_v38, %v307_v56  ;;  %279 = vst [vmem:[#allocation12 + $0x18] sm:$0xff] %v277_v58 }
 0x15a   :  { %327 = dma.vmem_to_hbm [thread:$0]  %s320_s15, 512, %s322_s17, [#allocation4], %s521_s13, %s521_s13, %s522_s14  }
 0x15b   :  { %314 = vst.msk [vmem:[%s642_s8 + $0x8] sm:$0xff] %vm312_vm5, %v311_v59 }
 0x15c   :  { %518 = dma.done.wait [#allocation4], 512  }
 0x15d   :  { %519 = vsyncadd [#allocation4], 4294966784 }
 0x15e   :  { %336 = vsyncpa [#allocation3], 1 }
 0x15f   :  { %337 = vsyncpa [#allocation7], 1 }
 0x160   :  { %338 = vsyncpa [#allocation10], 1 }
 0x161   :  { %339 = vsyncpa [#allocation4], 1 }
 0x162   :  { %340 = vsyncpa [#allocation5], 1 }

</bundles_post_ra>
